<compile_context>
chip_gen: v6e
topology: v6e:2x2x1
jax: 0.10.0
libtpu: 0.0.40
codegen_flags: <defaults>
</compile_context>

<pallas_src>
import functools

import jax
import jax.numpy as jnp
from jax import lax
from jax.experimental import pallas as pl
from jax.experimental.pallas import tpu as pltpu
import numpy as np


def _ray_dirs_kernel(coef_ref, dirs_ref, *, resolution, ts, use_recip_div):
    # coef_ref : SMEM (9*N,) -- per camera: [A0,B0,C0, A1,B1,C1, A2,B2,C2]
    #            with d_k = A_k * x_cam + B_k * y_cam + C_k
    # dirs_ref : VMEM block (3, ts, 128)  (leading camera dim squeezed out)
    n = pl.program_id(0)
    t = pl.program_id(1)
    n9 = n * 9

    inv_res = np.float32(1.0 / resolution)

    if resolution % 128 == 0:
        # Fast path: each sublane row of 128 lanes lies inside one image row,
        # so the row/col decomposition is per sublane row ((ts,1)) and x_cam is
        # an affine function of the lane index (one FMA per channel/element).
        rows_per = resolution // 128                 # sublane rows per image row
        r = lax.broadcasted_iota(jnp.int32, (ts, 1), 0)
        row = t * ts + r                             # global sublane row (ts,1)
        if rows_per & (rows_per - 1) == 0:
            sh = rows_per.bit_length() - 1
            i_idx = row >> sh
            jbase = (row & (rows_per - 1)) << 7
        else:
            i_idx = row // rows_per
            jbase = (row - i_idx * rows_per) << 7
        y_cam = (i_idx.astype(jnp.float32) + 0.5) * inv_res      # (ts,1)
        x0 = (jbase.astype(jnp.float32) + 0.5) * inv_res         # (ts,1)
        lane = lax.broadcasted_iota(jnp.int32, (ts, 128), 1).astype(jnp.float32)
        xl = lane * inv_res                                       # (ts,128)
        d = []
        for k in range(3):
            a = coef_ref[n9 + 3 * k + 0]
            b = coef_ref[n9 + 3 * k + 1]
            c = coef_ref[n9 + 3 * k + 2]
            base = a * x0 + b * y_cam + c                         # (ts,1)
            d.append(base + a * xl)                               # (ts,128)
    else:
        r = lax.broadcasted_iota(jnp.int32, (ts, 128), 0)
        l = lax.broadcasted_iota(jnp.int32, (ts, 128), 1)
        m = (t * ts + r) * 128 + l
        if resolution & (resolution - 1) == 0:
            # power-of-two resolution: shift/and, no divide
            sh = resolution.bit_length() - 1
            i_idx = m >> sh
            j_idx = m & (resolution - 1)
        elif use_recip_div:
            # int32 divide lowers to a long VPU sequence; use f32 reciprocal
            # multiply with a +/-1 correction instead (exact for m <= 2^24).
            i_idx = (m.astype(jnp.float32) * inv_res).astype(jnp.int32)
            j_idx = m - i_idx * resolution
            over = (j_idx >= resolution).astype(jnp.int32)
            under = (j_idx < 0).astype(jnp.int32)
            i_idx = i_idx + over - under
            j_idx = j_idx + (under - over) * resolution
        else:
            i_idx = m // resolution
            j_idx = m - i_idx * resolution
        x_cam = (j_idx.astype(jnp.float32) + 0.5) * inv_res   # from column j (flip(0))
        y_cam = (i_idx.astype(jnp.float32) + 0.5) * inv_res   # from row i
        d = []
        for k in range(3):
            a = coef_ref[n9 + 3 * k + 0]
            b = coef_ref[n9 + 3 * k + 1]
            c = coef_ref[n9 + 3 * k + 2]
            d.append(a * x_cam + b * y_cam + c)

    # torch.nn.functional.normalize: x / max(||x||, 1e-12) == x * rsqrt(max(ss,1e-24))
    ss = d[0] * d[0] + d[1] * d[1] + d[2] * d[2]
    inv_norm = lax.rsqrt(jnp.maximum(ss, np.float32(1e-24)))
    for k in range(3):
        dirs_ref[k, :, :] = (d[k] * inv_norm).astype(dirs_ref.dtype)


def ray_sampler(cam2world_matrix, intrinsics, resolution, channel_last=True,
                out_dtype=jnp.float32):
    """cam2world_matrix: (N,4,4), intrinsics: (N,3,3), resolution: int.

    Returns (ray_origins (1, M, 3) zeros,
             ray_dirs (N, M, 3) if channel_last else channel-major (N, 3, M))."""
    N = cam2world_matrix.shape[0]
    M = resolution * resolution

    cam2world_matrix = cam2world_matrix.astype(jnp.float32)
    intrinsics = intrinsics.astype(jnp.float32)

    # --- Fold intrinsics + cam2world rows into per-camera FMA coefficients (O(N)).
    # x_lift = ax*x_cam + bx*y_cam + c0 ; y_lift = ay*y_cam + c1 ; z_cam = 1
    # d_k = R[k,0]*x_lift + R[k,1]*y_lift + R[k,2] + R[k,3] = A_k*x + B_k*y + C_k
    fx = intrinsics[:, 0, 0]
    fy = intrinsics[:, 1, 1]
    cx = intrinsics[:, 0, 2]
    cy = intrinsics[:, 1, 2]
    sk = intrinsics[:, 0, 1]
    inv_fx = 1.0 / fx
    inv_fy = 1.0 / fy
    ax = inv_fx
    bx = -sk * inv_fx * inv_fy
    c0 = (cy * sk * inv_fy - cx) * inv_fx
    ay = inv_fy
    c1 = -cy * inv_fy
    R0 = cam2world_matrix[:, :3, 0]
    R1 = cam2world_matrix[:, :3, 1]
    R23 = cam2world_matrix[:, :3, 2] + cam2world_matrix[:, :3, 3]
    A = R0 * ax[:, None]
    B = R0 * bx[:, None] + R1 * ay[:, None]
    C = R0 * c0[:, None] + R1 * c1[:, None] + R23
    # Flat 1-D SMEM layout (a 2-D SMEM ref pads to [ceil(N/8)*8, 128] words).
    coef = jnp.stack([A, B, C], axis=-1).reshape(N * 9).astype(jnp.float32)

    # --- Balanced, aligned sublane tiling of the pixel axis with minimal padding.
    srows = -(-M // 128)
    SUBLANE_CAP = 1024                      # 1024 sublanes x 128 lanes x 3ch x 4B ~ 1.5 MiB/block
    num_tiles = max(1, -(-srows // SUBLANE_CAP))
    if N * num_tiles < 2 and srows >= 16:
        num_tiles = 2                       # keep both v7x TensorCores busy
    itemsize = jnp.dtype(out_dtype).itemsize
    sub_align = {4: 8, 2: 16, 1: 32}.get(itemsize, 8)
    ts = -(-srows // num_tiles)
    ts = ((ts + sub_align - 1) // sub_align) * sub_align
    srows_pad = num_tiles * ts

    use_recip_div = (srows_pad * 128) <= (1 << 24)

    kernel = functools.partial(_ray_dirs_kernel, resolution=resolution, ts=ts,
                               use_recip_div=use_recip_div)
    dirs = pl.pallas_call(
        kernel,
        out_shape=jax.ShapeDtypeStruct((N, 3, srows_pad, 128), out_dtype),
        grid=(N, num_tiles),
        in_specs=[pl.BlockSpec(memory_space=pltpu.MemorySpace.SMEM)],
        out_specs=pl.BlockSpec((None, 3, ts, 128), lambda n, t: (n, 0, t, 0)),
        compiler_params=pltpu.CompilerParams(
            dimension_semantics=("parallel", "parallel")),
    )(coef)

    # Free contiguous reshape; crop only when padding actually exists.
    dirs = dirs.reshape(N, 3, srows_pad * 128)
    if srows_pad * 128 != M:
        # TODO(synk): consumers that can mask/ignore the padded tail should take
        # the padded (N, 3, srows_pad*128) slab directly to skip this crop copy.
        dirs = dirs[:, :, :M]
    if channel_last:
        # PyTorch (N, M, 3) layout. Perf-sensitive consumers should pass
        # channel_last=False and consume channel-major (N, 3, M) to skip this
        # full HBM round-trip transpose.
        dirs = jnp.transpose(dirs, (0, 2, 1))

    ray_origins = jnp.zeros((1, M, 3), jnp.float32)   # cam_locs hard-coded to 0
    return ray_origins, dirs


def ray_sampler_ref(cam2world, intr, resolution):
    """Pure-JAX reference mirroring the PyTorch code line by line."""
    N = cam2world.shape[0]
    M = resolution ** 2
    fx = intr[:, 0, 0]
    fy = intr[:, 1, 1]
    cx = intr[:, 0, 2]
    cy = intr[:, 1, 2]
    sk = intr[:, 0, 1]
    ar = jnp.arange(resolution, dtype=jnp.float32)
    X, Y = jnp.meshgrid(ar, ar, indexing="ij")
    uv = jnp.stack([X, Y]) * (1.0 / resolution) + 0.5 / resolution
    uv = uv[::-1].reshape(2, -1).T                           # (M, 2)
    uv = jnp.broadcast_to(uv[None], (N, M, 2))
    x_cam = uv[:, :, 0]
    y_cam = uv[:, :, 1]
    z_cam = jnp.ones((N, M), jnp.float32)
    x_lift = (x_cam - cx[:, None] + cy[:, None] * sk[:, None] / fy[:, None]
              - sk[:, None] * y_cam / fy[:, None]) / fx[:, None] * z_cam
    y_lift = (y_cam - cy[:, None]) / fy[:, None] * z_cam
    cam_rel = jnp.stack([x_lift, y_lift, z_cam, jnp.ones_like(z_cam)], axis=-1)
    world = jnp.einsum("nij,nmj->nmi", cam2world, cam_rel)[:, :, :3]
    dirs = world / jnp.maximum(
        jnp.linalg.norm(world, axis=2, keepdims=True), 1e-12)
    origins = jnp.zeros((1, M, 3), jnp.float32)
    return origins, dirs


def _make_inputs(N, key):
    k1, k2, k3 = jax.random.split(key, 3)
    eye = jnp.broadcast_to(jnp.eye(4, dtype=jnp.float32), (N, 4, 4))
    cam2world = eye + 0.1 * jax.random.normal(k1, (N, 4, 4), jnp.float32)
    fx = 1.0 + 0.1 * jax.random.normal(k2, (N,), jnp.float32)
    fy = 1.0 + 0.1 * jax.random.normal(k3, (N,), jnp.float32)
    intrinsics = jnp.zeros((N, 3, 3), jnp.float32)
    intrinsics = intrinsics.at[:, 0, 0].set(fx)
    intrinsics = intrinsics.at[:, 1, 1].set(fy)
    intrinsics = intrinsics.at[:, 0, 2].set(0.5)
    intrinsics = intrinsics.at[:, 1, 2].set(0.5)
    intrinsics = intrinsics.at[:, 0, 1].set(0.01)
    intrinsics = intrinsics.at[:, 2, 2].set(1.0)
    return cam2world, intrinsics


if __name__ == "__main__":
    key = jax.random.PRNGKey(0)
    N = 2
    cam2world, intrinsics = _make_inputs(N, key)

    # Config 1: small power-of-two resolution (shift/and index path).
    res1 = 16  # M = 256
    origins, dirs = ray_sampler(cam2world, intrinsics, res1)
    jax.block_until_ready((origins, dirs))
    o_ref, d_ref = ray_sampler_ref(cam2world, intrinsics, res1)
    assert origins.shape == (1, res1 ** 2, 3)
    assert dirs.shape == (N, res1 ** 2, 3)
    np.testing.assert_allclose(np.asarray(origins), np.asarray(o_ref), atol=1e-6)
    np.testing.assert_allclose(np.asarray(dirs), np.asarray(d_ref),
                               rtol=1e-5, atol=1e-5)

    # Channel-major (no wrapper transpose) path.
    _, dirs_cm = ray_sampler(cam2world, intrinsics, res1, channel_last=False)
    jax.block_until_ready(dirs_cm)
    np.testing.assert_allclose(np.asarray(dirs_cm),
                               np.asarray(d_ref).transpose(0, 2, 1),
                               rtol=1e-5, atol=1e-5)

    # Config 2: non-power-of-two resolution (reciprocal-multiply index path).
    res2 = 48  # M = 2304
    o2, d2 = ray_sampler(cam2world[:1], intrinsics[:1], res2)
    jax.block_until_ready((o2, d2))
    o2_ref, d2_ref = ray_sampler_ref(cam2world[:1], intrinsics[:1], res2)
    np.testing.assert_allclose(np.asarray(o2), np.asarray(o2_ref), atol=1e-6)
    np.testing.assert_allclose(np.asarray(d2), np.asarray(d2_ref),
                               rtol=1e-5, atol=1e-5)

    # Config 3: resolution % 128 == 0 (row-decomposed fast path, forced 2-tile
    # grid for megacore, exact fit -> no crop copy).
    res3 = 128  # M = 16384
    o3, d3 = ray_sampler(cam2world[:1], intrinsics[:1], res3)
    jax.block_until_ready((o3, d3))
    _, d3_ref = ray_sampler_ref(cam2world[:1], intrinsics[:1], res3)
    np.testing.assert_allclose(np.asarray(d3), np.asarray(d3_ref),
                               rtol=1e-5, atol=1e-5)

    # Opt-in bf16 output (halves HBM writes on write-bound v5e/v6e).
    _, d_bf = ray_sampler(cam2world[:1], intrinsics[:1], res1,
                          out_dtype=jnp.bfloat16)
    jax.block_until_ready(d_bf)
    assert d_bf.dtype == jnp.bfloat16 and d_bf.shape == (1, res1 ** 2, 3)

    print("KERNEL_OK")
</pallas_src>

<mosaic_0001>
module attributes {stable_mosaic.version = 11 : i64} {
  func.func @_ray_dirs_kernel(%arg0: i32, %arg1: i32, %arg2: memref<18xf32, #tpu.memory_space<smem>>, %arg3: memref<1x3x8x128xf32, #tpu.memory_space<vmem>>) attributes {dimension_semantics = [#tpu.dimension_semantics<parallel>, #tpu.dimension_semantics<parallel>], iteration_bounds = array<i64: 2, 1>, scalar_prefetch = 0 : i64, scratch_operands = 0 : i64, tpu.core_type = #tpu.core_type<tc>, window_params = [{transform_indices = @transform_0, window_bounds = array<i64: 18>}, {transform_indices = @transform_1, window_bounds = array<i64: 1, 3, 8, 128>}]} {
    %c9_i32 = arith.constant 9 : i32
    %0 = arith.muli %arg0, %c9_i32 : i32
    %1 = tpu.iota {dimensions = array<i32: 0>} : vector<8x128xi32>
    %2 = tpu.iota {dimensions = array<i32: 1>} : vector<8x128xi32>
    %c8_i32 = arith.constant 8 : i32
    %3 = arith.muli %arg1, %c8_i32 : i32
    %4 = vector.broadcast %3 : i32 to vector<8x128xi32>
    %5 = arith.addi %4, %1 : vector<8x128xi32>
    %c128_i32 = arith.constant 128 : i32
    %6 = vector.broadcast %c128_i32 : i32 to vector<8x128xi32>
    %7 = arith.muli %5, %6 : vector<8x128xi32>
    %8 = arith.addi %7, %2 : vector<8x128xi32>
    %c4_i32 = arith.constant 4 : i32
    %9 = vector.broadcast %c4_i32 : i32 to vector<8x128xi32>
    %10 = arith.shrsi %8, %9 : vector<8x128xi32>
    %c15_i32 = arith.constant 15 : i32
    %11 = vector.broadcast %c15_i32 : i32 to vector<8x128xi32>
    %12 = arith.andi %8, %11 : vector<8x128xi32>
    %13 = arith.sitofp %12 : vector<8x128xi32> to vector<8x128xf32>
    %cst = arith.constant 5.000000e-01 : f32
    %14 = vector.broadcast %cst : f32 to vector<8x128xf32>
    %15 = arith.addf %13, %14 : vector<8x128xf32>
    %cst_0 = arith.constant 6.250000e-02 : f32
    %16 = vector.broadcast %cst_0 : f32 to vector<8x128xf32>
    %17 = arith.mulf %15, %16 : vector<8x128xf32>
    %18 = arith.sitofp %10 : vector<8x128xi32> to vector<8x128xf32>
    %cst_1 = arith.constant 5.000000e-01 : f32
    %19 = vector.broadcast %cst_1 : f32 to vector<8x128xf32>
    %20 = arith.addf %18, %19 : vector<8x128xf32>
    %cst_2 = arith.constant 6.250000e-02 : f32
    %21 = vector.broadcast %cst_2 : f32 to vector<8x128xf32>
    %22 = arith.mulf %20, %21 : vector<8x128xf32>
    %c0_i32 = arith.constant 0 : i32
    %23 = arith.addi %0, %c0_i32 : i32
    %c0_i32_3 = arith.constant 0 : i32
    %24 = arith.addi %23, %c0_i32_3 : i32
    %25 = arith.index_cast %24 : i32 to index
    %26 = memref.load %arg2[%25] : memref<18xf32, #tpu.memory_space<smem>>
    %c0_i32_4 = arith.constant 0 : i32
    %27 = arith.addi %0, %c0_i32_4 : i32
    %c1_i32 = arith.constant 1 : i32
    %28 = arith.addi %27, %c1_i32 : i32
    %29 = arith.index_cast %28 : i32 to index
    %30 = memref.load %arg2[%29] : memref<18xf32, #tpu.memory_space<smem>>
    %c0_i32_5 = arith.constant 0 : i32
    %31 = arith.addi %0, %c0_i32_5 : i32
    %c2_i32 = arith.constant 2 : i32
    %32 = arith.addi %31, %c2_i32 : i32
    %33 = arith.index_cast %32 : i32 to index
    %34 = memref.load %arg2[%33] : memref<18xf32, #tpu.memory_space<smem>>
    %35 = vector.broadcast %26 : f32 to vector<8x128xf32>
    %36 = arith.mulf %35, %17 : vector<8x128xf32>
    %37 = vector.broadcast %30 : f32 to vector<8x128xf32>
    %38 = arith.mulf %37, %22 : vector<8x128xf32>
    %39 = arith.addf %36, %38 : vector<8x128xf32>
    %40 = vector.broadcast %34 : f32 to vector<8x128xf32>
    %41 = arith.addf %39, %40 : vector<8x128xf32>
    %c3_i32 = arith.constant 3 : i32
    %42 = arith.addi %0, %c3_i32 : i32
    %c0_i32_6 = arith.constant 0 : i32
    %43 = arith.addi %42, %c0_i32_6 : i32
    %44 = arith.index_cast %43 : i32 to index
    %45 = memref.load %arg2[%44] : memref<18xf32, #tpu.memory_space<smem>>
    %c3_i32_7 = arith.constant 3 : i32
    %46 = arith.addi %0, %c3_i32_7 : i32
    %c1_i32_8 = arith.constant 1 : i32
    %47 = arith.addi %46, %c1_i32_8 : i32
    %48 = arith.index_cast %47 : i32 to index
    %49 = memref.load %arg2[%48] : memref<18xf32, #tpu.memory_space<smem>>
    %c3_i32_9 = arith.constant 3 : i32
    %50 = arith.addi %0, %c3_i32_9 : i32
    %c2_i32_10 = arith.constant 2 : i32
    %51 = arith.addi %50, %c2_i32_10 : i32
    %52 = arith.index_cast %51 : i32 to index
    %53 = memref.load %arg2[%52] : memref<18xf32, #tpu.memory_space<smem>>
    %54 = vector.broadcast %45 : f32 to vector<8x128xf32>
    %55 = arith.mulf %54, %17 : vector<8x128xf32>
    %56 = vector.broadcast %49 : f32 to vector<8x128xf32>
    %57 = arith.mulf %56, %22 : vector<8x128xf32>
    %58 = arith.addf %55, %57 : vector<8x128xf32>
    %59 = vector.broadcast %53 : f32 to vector<8x128xf32>
    %60 = arith.addf %58, %59 : vector<8x128xf32>
    %c6_i32 = arith.constant 6 : i32
    %61 = arith.addi %0, %c6_i32 : i32
    %c0_i32_11 = arith.constant 0 : i32
    %62 = arith.addi %61, %c0_i32_11 : i32
    %63 = arith.index_cast %62 : i32 to index
    %64 = memref.load %arg2[%63] : memref<18xf32, #tpu.memory_space<smem>>
    %c6_i32_12 = arith.constant 6 : i32
    %65 = arith.addi %0, %c6_i32_12 : i32
    %c1_i32_13 = arith.constant 1 : i32
    %66 = arith.addi %65, %c1_i32_13 : i32
    %67 = arith.index_cast %66 : i32 to index
    %68 = memref.load %arg2[%67] : memref<18xf32, #tpu.memory_space<smem>>
    %c6_i32_14 = arith.constant 6 : i32
    %69 = arith.addi %0, %c6_i32_14 : i32
    %c2_i32_15 = arith.constant 2 : i32
    %70 = arith.addi %69, %c2_i32_15 : i32
    %71 = arith.index_cast %70 : i32 to index
    %72 = memref.load %arg2[%71] : memref<18xf32, #tpu.memory_space<smem>>
    %73 = vector.broadcast %64 : f32 to vector<8x128xf32>
    %74 = arith.mulf %73, %17 : vector<8x128xf32>
    %75 = vector.broadcast %68 : f32 to vector<8x128xf32>
    %76 = arith.mulf %75, %22 : vector<8x128xf32>
    %77 = arith.addf %74, %76 : vector<8x128xf32>
    %78 = vector.broadcast %72 : f32 to vector<8x128xf32>
    %79 = arith.addf %77, %78 : vector<8x128xf32>
    %80 = arith.mulf %41, %41 : vector<8x128xf32>
    %81 = arith.mulf %60, %60 : vector<8x128xf32>
    %82 = arith.addf %80, %81 : vector<8x128xf32>
    %83 = arith.mulf %79, %79 : vector<8x128xf32>
    %84 = arith.addf %82, %83 : vector<8x128xf32>
    %cst_16 = arith.constant 1.000000e-24 : f32
    %85 = vector.broadcast %cst_16 : f32 to vector<8x128xf32>
    %86 = arith.maximumf %84, %85 : vector<8x128xf32>
    %87 = math.rsqrt %86 : vector<8x128xf32>
    %88 = arith.mulf %41, %87 : vector<8x128xf32>
    %c0 = arith.constant 0 : index
    %c0_17 = arith.constant 0 : index
    %c0_18 = arith.constant 0 : index
    %c0_19 = arith.constant 0 : index
    %89 = vector.load %arg3[%c0, %c0_17, %c0_18, %c0_19] : memref<1x3x8x128xf32, #tpu.memory_space<vmem>>, vector<1x1x8x128xf32>
    %90 = vector.shape_cast %89 : vector<1x1x8x128xf32> to vector<8x128xf32>
    %91 = vector.shape_cast %88 : vector<8x128xf32> to vector<1x1x8x128xf32>
    tpu.vector_store %arg3[%c0, %c0_17, %c0_18, %c0_19], %91 {strides = array<i32>} : memref<1x3x8x128xf32, #tpu.memory_space<vmem>>, vector<1x1x8x128xf32>,
    %92 = arith.mulf %60, %87 : vector<8x128xf32>
    %c0_20 = arith.constant 0 : index
    %c1 = arith.constant 1 : index
    %c0_21 = arith.constant 0 : index
    %c0_22 = arith.constant 0 : index
    %93 = vector.load %arg3[%c0_20, %c1, %c0_21, %c0_22] : memref<1x3x8x128xf32, #tpu.memory_space<vmem>>, vector<1x1x8x128xf32>
    %94 = vector.shape_cast %93 : vector<1x1x8x128xf32> to vector<8x128xf32>
    %95 = vector.shape_cast %92 : vector<8x128xf32> to vector<1x1x8x128xf32>
    tpu.vector_store %arg3[%c0_20, %c1, %c0_21, %c0_22], %95 {strides = array<i32>} : memref<1x3x8x128xf32, #tpu.memory_space<vmem>>, vector<1x1x8x128xf32>,
    %96 = arith.mulf %79, %87 : vector<8x128xf32>
    %c0_23 = arith.constant 0 : index
    %c2 = arith.constant 2 : index
    %c0_24 = arith.constant 0 : index
    %c0_25 = arith.constant 0 : index
    %97 = vector.load %arg3[%c0_23, %c2, %c0_24, %c0_25] : memref<1x3x8x128xf32, #tpu.memory_space<vmem>>, vector<1x1x8x128xf32>
    %98 = vector.shape_cast %97 : vector<1x1x8x128xf32> to vector<8x128xf32>
    %99 = vector.shape_cast %96 : vector<8x128xf32> to vector<1x1x8x128xf32>
    tpu.vector_store %arg3[%c0_23, %c2, %c0_24, %c0_25], %99 {strides = array<i32>} : memref<1x3x8x128xf32, #tpu.memory_space<vmem>>, vector<1x1x8x128xf32>,
    return
  }
  func.func @transform_0(%arg0: i32, %arg1: i32) -> i32 {
    %c0_i32 = arith.constant 0 : i32
    %c0_i32_0 = arith.constant 0 : i32
    return %c0_i32 : i32
  }
  func.func @transform_1(%arg0: i32, %arg1: i32) -> (i32, i32, i32, i32) {
    %c0_i32 = arith.constant 0 : i32
    %c0_i32_0 = arith.constant 0 : i32
    %c0_i32_1 = arith.constant 0 : i32
    return %arg0, %c0_i32, %arg1, %c0_i32_0 : i32, i32, i32, i32
  }
}

</mosaic_0001>

<bundles_post_ra>
// kernel: tpu_custom_call.1
= control target key start
LH: loop header
LB: loop body
LE: loop exit
PB: predicated region body
PF: predicated region fallthrough
CT: control target
= control target key end

     0   :  { %6 = vsyncpa [#allocation4], 0  ;;  %s591_s0 = inlined_call_operand.hbm [shape: f32[18], index: 0, kind: input, shape index: {}]   ;;  %s592_s1 = inlined_call_operand.hbm [shape: f32[2,3,8,128], index: 1, kind: output, shape index: {}]  }
   0x1   :  { %7 = vsyncpa [#allocation3], 0 }
   0x2   :  { %9 = vsyncpa [#allocation3 + $0x1], 0  ;;  %s469_s6 = smov 0   ;;  %s471_s7 = smov 0  }
   0x3   :  { %s473_s8 = smov 0   ;;  %s475_s9 = smov 0  }
   0x4   :  { %s477_s10 = smov 0   ;;  %s479_s11 = smov 0  }
   0x5 LB: > { %s279_s12 = sadd.s32 4294967295, %s453_s11   ;;  %s280_s13 = sadd.s32 4294967294, %s453_s11   ;;  %s453_s11 = sphi %s479_s11, %s15_s11   ;;  %s449_s10 = sphi %s477_s10, %s599_s10   ;;  %s445_s9 = sphi %s475_s9, %s598_s9   ;;  %s441_s8 = sphi %s473_s8, %s597_s8   ;;  %s437_s7 = sphi %s471_s7, %s596_s7   ;;  %s433_s6 = sphi %s469_s6, %s595_s6  }
   0x6   : > { %s27_s14 = sadd.s32 1, %s449_s10  ;;  %s57_s15 = sadd.s32 1, %s441_s8 }
   0x7   : > { %p29_p0 = scmp.ge.s32.totalorder %s27_s14, 2  ;;  %p67_p1 = scmp.ne.s32.totalorder %s441_s8, %s437_s7 }
   0x8   : > { %p68_p2 = scmp.eq.s32.totalorder %s279_s12, 1  ;;  %p73_p3 = scmp.ne.s32.totalorder %s437_s7, %s433_s6 }
   0x9   : > { %s601_s14 = smov (%p29_p0, %s27_s14), 0  ;;  %p74_p5 = scmp.eq.s32.totalorder %s280_s13, 1 }
   0xa   : > { %p509_p4 = por %p68_p2, %p67_p1  ;;  %s52_s17 = ssub.s32 %s449_s10, %s601_s14 }
   0xb   : > { %p281_p6 = scmp.ge.s32.totalorder %s453_s11, 1  ;;  %p55_p7 = scmp.eq.s32.totalorder %s52_s17, 0 }
   0xc   : > { %p516_p8 = por %p74_p5, %p73_p3  ;;  %p81_p9 = scmp.lt.s32.totalorder %s453_s11, 3 }
   0xd   : > { %s522_s19 = scalar_select %p55_p7, %s441_s8, %s57_s15  }
   0xe   : > { %p82_p10 = pnand %p281_p6, %p81_p9  ;;  %p306_p11 = scmp.eq.s32.totalorder %s279_s12, 0 }
   0xf   : > { %s455_s20 = smov [#allocation2]  }
  0x10   : > { %p298_p12 = pneg %p82_p10  ;;  %105 = sbr.rel (%p82_p10) target bundleno = 85 (0x55), region = 24 }
  0x12   : > { %p299_p13 = pnand %p306_p11, %p298_p12 }
  0x14   : > { %301 = dma.hbm_to_smem (!%p299_p13), %s591_s0, 16, %s455_s20, [#allocation4]  }
  0x15   : > { %424 = dma.done.wait (%p306_p11), [#allocation4], 16  }
  0x16   : > { %426 = vsyncadd (%p306_p11), [#allocation4], 4294967280 }
  0x17   : > { %111 = sfence }
  0x18   : > { %s121_s23 = smul.u32 9, %s445_s9  ;;  %v122_v0 = vlaneseq  ;;  %s118_s22 = sand.u32 1, %s437_s7  }
  0x1a   : > { %v123_v1 = vshrl.u32 %v122_v0, 7  ;;  %v125_v2 = vand.u32 127, %v122_v0  ;;  %s528_s24 = sld [smem:[#allocation2 + %s121_s23]]  ;;  %s140_s25 = sadd.s32 1, %s121_s23 }
  0x1b   : > { %s530_s26 = sld [smem:[#allocation2 + %s140_s25]]  ;;  %s142_s27 = sadd.s32 2, %s121_s23 }
  0x1c   : > { %v129_v3 = vmul.u32 128, %v123_v1  ;;  %s151_s28 = sadd.s32 3, %s121_s23  ;;  %s532_s29 = sld [smem:[#allocation2 + %s142_s27]] }
  0x1d   : > { %s153_s30 = sadd.s32 4, %s121_s23  ;;  %s152_s2 = sld [smem:[#allocation2 + %s151_s28]] }
  0x1e   : > { %v130_v4 = vadd.s32 %v129_v3, %v125_v2  ;;  %s155_s3 = sadd.s32 5, %s121_s23  ;;  %s154_s4 = sld [smem:[#allocation2 + %s153_s30]] }
  0x1f   : > { %s164_s5 = sadd.s32 6, %s121_s23  ;;  %s156_s12 = sld [smem:[#allocation2 + %s155_s3]] }
  0x20   : > { %v131_v5 = vshra.s32 %v130_v4, 4  ;;  %v132_v6 = vand.u32 15, %v130_v4  ;;  %s166_s13 = sadd.s32 7, %s121_s23  ;;  %s165_s15 = sld [smem:[#allocation2 + %s164_s5]]  ;;  %v144_v11 = vstv %s528_s24 }
  0x21   : > { %s168_s17 = sadd.s32 8, %s121_s23  ;;  %s167_s20 = sld [smem:[#allocation2 + %s166_s13]]  ;;  %v146_v12 = vstv %s530_s26 }
  0x22   : > { %v133_v7 = vcvt.s32.f32 %v132_v6  ;;  %v136_v8 = vcvt.s32.f32 %v131_v5  ;;  %s169_s21 = sld [smem:[#allocation2 + %s168_s17]]  ;;  %v149_v22 = vstv %s532_s29  ;;  %s290_s23 = smul.u32 24, %s118_s22 }
  0x23   : > { %v157_v13 = vstv %s152_s2  ;;  %s291_s26 = smul.u32 384, %s445_s9  ;;  %s546_s30 = scalar_lea.sflag [#allocation3], %s118_s22 }
  0x24   : > { %v134_v9 = vadd.f32 0.5, %v133_v7  ;;  %v137_v10 = vadd.f32 0.5, %v136_v8  ;;  %v159_v14 = vstv %s154_s4  ;;  %s120_s24 = scalar_lea.vmem [#allocation5], %s290_s23  ;;  %s456_s2 = smov [#allocation5]  }
  0x25   : > { %v162_v23 = vstv %s156_s12  ;;  %s207_s25 = sshll.u32 %s120_s24, 4  ;;  %s544_s29 = scalar_lea.hbm %s592_s1, %s291_s26  ;;  %s539_s25 = int_to_ptr.vmem [resolvable:$true] %s207_s25 }
  0x26   : > { %v135_v15 = vmul.f32 0.0625, %v134_v9  ;;  %v138_v16 = vmul.f32 0.0625, %v137_v10  ;;  %v170_v17 = vstv %s165_s15  ;;  %s373_s9 = scalar_lea.vmem %s539_s25, 384  ;;  %s377_s3 = sshll.u32 %s456_s2, 4  ;;  %s378_s3 = int_to_ptr.vmem [resolvable:$false] %s377_s3 }
  0x27   : > { %v172_v25 = vstv %s167_s20  ;;  %p374_p0 = scmp.ne.s32.totalorder %s539_s25, %s373_s9  ;;  %s379_s4 = scalar_lea.vmem %s378_s3, 768 }
  0x28   : > { %v145_v18 = vmul.f32 %v144_v11, %v135_v15  ;;  %v147_v19 = vmul.f32 %v146_v12, %v138_v16  ;;  %v158_v20 = vmul.f32 %v157_v13, %v135_v15  ;;  %v160_v21 = vmul.f32 %v159_v14, %v138_v16  ;;  %p380_p3 = scmp.lt.s32.totalorder %s539_s25, %s378_s3  ;;  %p381_p5 = scmp.lt.s32.totalorder %s379_s4, %s373_s9 }
  0x29   : > { %v171_v24 = vmul.f32 %v170_v17, %v135_v15  ;;  %v173_v28 = vmul.f32 %v172_v25, %v138_v16  ;;  %v175_v29 = vstv %s169_s21  ;;  %p375_p1 = pnand %p374_p0, %p509_p4 }
  0x2a   : > { %v148_v26 = vadd.f32 %v147_v19, %v145_v18  ;;  %v161_v27 = vadd.f32 %v160_v21, %v158_v20  ;;  %p382_p6 = por %p381_p5, %p380_p3 }
  0x2b   : > { %v174_v32 = vadd.f32 %v173_v28, %v171_v24  ;;  %p376_p2 = pneg %p375_p1 }
  0x2c   : > { %v150_v30 = vadd.f32 %v149_v22, %v148_v26  ;;  %v163_v31 = vadd.f32 %v162_v23, %v161_v27 }
  0x2d   : > { %v176_v33 = vadd.f32 %v175_v29, %v174_v32  ;;  %p383_p7 = pnand %p382_p6, %p376_p2 }
  0x2e   : > { %v177_v34 = vmul.f32 %v150_v30, %v150_v30  ;;  %v178_v35 = vmul.f32 %v163_v31, %v163_v31 }
  0x2f   : > { %v180_v37 = vmul.f32 %v176_v33, %v176_v33 }
  0x30   : > { %v179_v36 = vadd.f32 %v178_v35, %v177_v34 }
  0x32   : > { %v181_v38 = vadd.f32 %v180_v37, %v179_v36 }
  0x34   : > { %v182_v39 = vmax.f32 %v181_v38, 1e-24 }
  0x36   : > { %360 = vrsqrt.f32 %v182_v39 }
  0x43   : > { %v361_v40 = vpop.eup %360 }
  0x44   : > { %v184_v41 = vmul.f32 %v361_v40, %v150_v30  ;;  %v186_v42 = vmul.f32 %v361_v40, %v163_v31  ;;  %v189_v43 = vmul.f32 %v361_v40, %v176_v33 }
  0x46   : > { %185 = vst [vmem:[%s120_s24] sm:$0xff] %v184_v41  ;;  %285 = vst [vmem:[%s120_s24 + $0x8] sm:$0xff] %v186_v42 }
  0x47   : > { %286 = vst [vmem:[%s120_s24 + $0x10] sm:$0xff] %v189_v43 }
  0x48   : > { %386 = shalt.err (!%p383_p7)
}
  0x49   : > { %s387_s5 = scalar_lea.hbm %s544_s29, 384  ;;  %s391_s15 = scalar_lea.hbm %s592_s1, 768 }
  0x4a   : > { %p388_p9 = scmp.ne.s32.totalorder %s544_s29, %s387_s5  ;;  %p392_p12 = scmp.lt.s32.totalorder %s544_s29, %s592_s1 }
  0x4b   : > { %p393_p13 = scmp.lt.s32.totalorder %s391_s15, %s387_s5 }
  0x4c   : > { %p389_p10 = pnand %p388_p9, %p509_p4 }
  0x4d   : > { %p394_p0 = por %p393_p13, %p392_p12 }
  0x4e   : > { %p390_p11 = pneg %p389_p10 }
  0x50   : > { %p395_p1 = pnand %p394_p0, %p390_p11 }
  0x52   : > { %398 = shalt.err (!%p395_p1)
}
  0x53   : > { %s457_s21 = smov 128   ;;  %s458_s22 = smov 8  }
  0x54   : > { %296 = dma.vmem_to_hbm [thread:$0]  (%p509_p4), %s539_s25, 384, %s544_s29, %s546_s30, %s457_s21, %s457_s21, %s458_s22  }
  0x55 PF: > { %p308_p2 = scmp.ge.s32.totalorder %s453_s11, 2  ;;  %s222_s23 = sand.u32 1, %s433_s6  }
  0x56   : > { %s223_s24 = scalar_lea.sflag [#allocation3], %s222_s23 }
  0x57   : > { %p303_p3 = pnand %p308_p2, %p516_p8 }
  0x59   : > { %p304_p5 = pneg %p303_p3 }
  0x5b   : > { %428 = dma.done.wait (%p304_p5), %s223_s24, 384  }
  0x5c   : > { %430 = vsyncadd (%p304_p5), %s223_s24, 4294966912  ;;  %s15_s11 = sadd.s32 1, %s453_s11   ;;  %s595_s6 = smov %s437_s7 }
  0x5d   : > { %p12_p6 = scmp.ge.s32.totalorder %s15_s11, 4   ;;  %s596_s7 = smov %s441_s8 }
  0x5e   : > { %s597_s8 = smov %s522_s19  ;;  %s598_s9 = smov %s449_s10 }
  0x5f   : > { %s599_s10 = smov %s601_s14  ;;  %14 = sbr.rel (!%p12_p6) target bundleno = 5 (0x5), region = 63 }
  0x64   :  { %228 = vsyncpa [#allocation3], 1 }
  0x65   :  { %230 = vsyncpa [#allocation3 + $0x1], 1 }
  0x66   :  { %231 = vsyncpa [#allocation4], 1 }
  0x67   :  { %233 = vsyncpa [#allocation4 + $0x1], 1 }

</bundles_post_ra>
